<compile_context>
chip_gen: v6e
topology: v6e:2x2x1
jax: 0.10.0
libtpu: 0.0.40
codegen_flags: <defaults>
</compile_context>

<pallas_src>
import functools

import numpy as np

import jax
import jax.numpy as jnp
from jax.experimental import pallas as pl
from jax.experimental.pallas import tpu as pltpu

_BN_EPS = 1e-5


# ----------------------------------------------------------------------------
# Convention-free shift along the flat (lane) axis: result[:, p] = a[:, p + d]
# for in-range p; out-of-range positions are zero (and masked anyway).
# ----------------------------------------------------------------------------
def _shift_flat(a, d):
    if d == 0:
        return a
    c, length = a.shape
    if d > 0:
        return jnp.concatenate(
            [a[:, d:], jnp.zeros((c, d), a.dtype)], axis=1)
    return jnp.concatenate(
        [jnp.zeros((c, -d), a.dtype), a[:, :length + d]], axis=1)


# ----------------------------------------------------------------------------
# Single-matmul 3x3 "SAME" conv on a (Cin, N*H*W) activation slab.
#   w_merged: (Cout, 9*Cin), tap-major (kh, kw) then input channel.
#   mask:     (9*Cin, N*HW) precomputed boundary mask (1 inside image, 0 out).
# ----------------------------------------------------------------------------
def _conv3x3(a, w_merged, mask, img_w):
    taps = []
    for dh in (-1, 0, 1):
        for dw in (-1, 0, 1):
            taps.append(_shift_flat(a, dh * img_w + dw))
    patch = jnp.concatenate(taps, axis=0) * mask          # (9*Cin, N*HW)
    return jnp.dot(w_merged, patch, preferred_element_type=jnp.float32)


# ----------------------------------------------------------------------------
# Fully fused ResidualBlock kernel (single grid step, everything in VMEM).
# ----------------------------------------------------------------------------
def _residual_block_kernel(x_ref, w1_ref, w2_ref, mask_ref,
                           g1_ref, b1_ref, g2_ref, b2_ref, o_ref,
                           *, img_w, inv_count):
    x = x_ref[...]                     # (C, N*HW) f32
    mask = mask_ref[...]               # (9*C, N*HW) f32

    def bn_affine(y, g_ref, b_ref):
        # Training-mode BN over the (N, H, W) axes == lane axis here.
        mean = jnp.sum(y, axis=1, keepdims=True) * inv_count
        var = jnp.sum(y * y, axis=1, keepdims=True) * inv_count - mean * mean
        var = jnp.maximum(var, 0.0)                       # single-pass guard
        scale = g_ref[...] * jax.lax.rsqrt(var + _BN_EPS)  # EUP rsqrt
        shift = b_ref[...] - mean * scale
        return scale, shift

    # conv1 -> BN1 -> ReLU
    y1 = _conv3x3(x, w1_ref[...], mask, img_w)             # (C, N*HW) f32
    s1, t1 = bn_affine(y1, g1_ref, b1_ref)
    a1 = jnp.maximum(y1 * s1 + t1, 0.0)

    # conv2 -> BN2 -> +residual -> ReLU
    y2 = _conv3x3(a1, w2_ref[...], mask, img_w)
    s2, t2 = bn_affine(y2, g2_ref, b2_ref)
    o_ref[...] = jnp.maximum(y2 * s2 + t2 + x, 0.0)


# ----------------------------------------------------------------------------
# Precomputed per-tap image-boundary masks, broadcast to the patch layout.
# ----------------------------------------------------------------------------
def _patch_mask(n, c, h, w):
    hw = h * w
    q = np.arange(n * hw) % hw
    row, col = q // w, q % w
    rows = []
    for dh in (-1, 0, 1):
        for dw in (-1, 0, 1):
            m = np.ones(n * hw, dtype=np.float32)
            if dh == -1:
                m = m * (row >= 1)
            elif dh == 1:
                m = m * (row <= h - 2)
            if dw == -1:
                m = m * (col >= 1)
            elif dw == 1:
                m = m * (col <= w - 2)
            rows.append(np.broadcast_to(m, (c, n * hw)))
    return np.concatenate(rows, axis=0).astype(np.float32)   # (9c, n*hw)


# ----------------------------------------------------------------------------
# ResidualBlock forward (stride=1, downsample=None => residual = x).
# Weights are in PyTorch OIHW layout: (Cout, Cin, 3, 3).
# ----------------------------------------------------------------------------
@jax.jit
def residual_block_forward(x_nchw, w1_oihw, g1, b1, w2_oihw, g2, b2):
    n, c, h, w = x_nchw.shape
    hw = h * w
    nhw = n * hw

    # Channels on sublanes, batch*spatial flattened on lanes (lane-dense).
    x_flat = jnp.transpose(x_nchw, (1, 0, 2, 3)).reshape(c, nhw)
    # OIHW -> (O, kh, kw, I) -> (O, 9*I), tap-major to match the patch packing.
    w1m = jnp.transpose(w1_oihw, (0, 2, 3, 1)).reshape(c, 9 * c)
    w2m = jnp.transpose(w2_oihw, (0, 2, 3, 1)).reshape(c, 9 * c)
    mask = jnp.asarray(_patch_mask(n, c, h, w))             # trace-time const
    g1c, b1c = g1.reshape(c, 1), b1.reshape(c, 1)
    g2c, b2c = g2.reshape(c, 1), b2.reshape(c, 1)

    kern = functools.partial(_residual_block_kernel,
                             img_w=w, inv_count=1.0 / nhw)
    full2d = lambda i: (0, 0)
    out = pl.pallas_call(
        kern,
        out_shape=jax.ShapeDtypeStruct((c, nhw), jnp.float32),
        grid_spec=pltpu.PrefetchScalarGridSpec(
            num_scalar_prefetch=0,
            grid=(1,),
            in_specs=[
                pl.BlockSpec((c, nhw), full2d),        # x
                pl.BlockSpec((c, 9 * c), full2d),      # merged conv1 weights
                pl.BlockSpec((c, 9 * c), full2d),      # merged conv2 weights
                pl.BlockSpec((9 * c, nhw), full2d),    # tap boundary mask
                pl.BlockSpec((c, 1), full2d),          # gamma1
                pl.BlockSpec((c, 1), full2d),          # beta1
                pl.BlockSpec((c, 1), full2d),          # gamma2
                pl.BlockSpec((c, 1), full2d),          # beta2
            ],
            out_specs=pl.BlockSpec((c, nhw), full2d),
        ),
        compiler_params=pltpu.CompilerParams(
            dimension_semantics=("arbitrary",)),
    )(x_flat, w1m, w2m, mask, g1c, b1c, g2c, b2c)

    return jnp.transpose(out.reshape(c, n, h, w), (1, 0, 2, 3))


# ----------------------------------------------------------------------------
# Pure-JAX reference for validation (training-mode BN, biased variance).
# ----------------------------------------------------------------------------
def ref_forward(x_nchw, w1_oihw, g1, b1, w2_oihw, g2, b2, eps=_BN_EPS):
    x = jnp.transpose(x_nchw, (0, 2, 3, 1))
    w1 = jnp.transpose(w1_oihw, (2, 3, 1, 0))   # OIHW -> HWIO
    w2 = jnp.transpose(w2_oihw, (2, 3, 1, 0))

    def conv(x, w):
        return jax.lax.conv_general_dilated(
            x, w, (1, 1), "SAME", dimension_numbers=("NHWC", "HWIO", "NHWC"))

    def bn(x, g, b):
        mean = jnp.mean(x, axis=(0, 1, 2))
        var = jnp.mean((x - mean) ** 2, axis=(0, 1, 2))
        return (x - mean) / jnp.sqrt(var + eps) * g + b

    out = jax.nn.relu(bn(conv(x, w1), g1, b1))
    out = bn(conv(out, w2), g2, b2) + x
    out = jax.nn.relu(out)
    return jnp.transpose(out, (0, 3, 1, 2))


if __name__ == "__main__":
    N, C, H, W = 2, 8, 16, 16   # in_channels == out_channels (downsample=None)
    key = jax.random.PRNGKey(0)
    kx, k1, k2, kg1, kb1, kg2, kb2 = jax.random.split(key, 7)

    x = jax.random.normal(kx, (N, C, H, W), jnp.float32)
    # Deterministic synthetic parameters in PyTorch layouts.
    w1 = jax.random.normal(k1, (C, C, 3, 3), jnp.float32) * 0.1   # OIHW
    w2 = jax.random.normal(k2, (C, C, 3, 3), jnp.float32) * 0.1
    g1 = 1.0 + 0.1 * jax.random.normal(kg1, (C,), jnp.float32)
    b1 = 0.1 * jax.random.normal(kb1, (C,), jnp.float32)
    g2 = 1.0 + 0.1 * jax.random.normal(kg2, (C,), jnp.float32)
    b2 = 0.1 * jax.random.normal(kb2, (C,), jnp.float32)

    out = residual_block_forward(x, w1, g1, b1, w2, g2, b2)
    out = jax.block_until_ready(out)

    ref = ref_forward(x, w1, g1, b1, w2, g2, b2)
    assert out.shape == (N, C, H, W)
    err = float(jnp.max(jnp.abs(out - ref)))
    assert jnp.allclose(out, ref, atol=1e-4, rtol=1e-4), f"max err {err}"

    print("KERNEL_OK")
</pallas_src>

<mosaic_0001>
module attributes {stable_mosaic.version = 11 : i64} {
  func.func @_residual_block_kernel(%arg0: i32, %arg1: memref<8x512xf32, #tpu.memory_space<vmem>>, %arg2: memref<8x72xf32, #tpu.memory_space<vmem>>, %arg3: memref<8x72xf32, #tpu.memory_space<vmem>>, %arg4: memref<72x512xf32, #tpu.memory_space<vmem>>, %arg5: memref<8x1xf32, #tpu.memory_space<vmem>>, %arg6: memref<8x1xf32, #tpu.memory_space<vmem>>, %arg7: memref<8x1xf32, #tpu.memory_space<vmem>>, %arg8: memref<8x1xf32, #tpu.memory_space<vmem>>, %arg9: memref<8x512xf32, #tpu.memory_space<vmem>>) attributes {dimension_semantics = [#tpu.dimension_semantics<arbitrary>], iteration_bounds = array<i64: 1>, scalar_prefetch = 0 : i64, scratch_operands = 0 : i64, tpu.core_type = #tpu.core_type<tc>, window_params = [{pipeline_mode = #tpu.pipeline_mode<synchronous>, transform_indices = @transform_0, window_bounds = array<i64: 8, 512>}, {pipeline_mode = #tpu.pipeline_mode<synchronous>, transform_indices = @transform_1, window_bounds = array<i64: 8, 72>}, {pipeline_mode = #tpu.pipeline_mode<synchronous>, transform_indices = @transform_2, window_bounds = array<i64: 8, 72>}, {pipeline_mode = #tpu.pipeline_mode<synchronous>, transform_indices = @transform_3, window_bounds = array<i64: 72, 512>}, {pipeline_mode = #tpu.pipeline_mode<synchronous>, transform_indices = @transform_4, window_bounds = array<i64: 8, 1>}, {pipeline_mode = #tpu.pipeline_mode<synchronous>, transform_indices = @transform_5, window_bounds = array<i64: 8, 1>}, {pipeline_mode = #tpu.pipeline_mode<synchronous>, transform_indices = @transform_6, window_bounds = array<i64: 8, 1>}, {pipeline_mode = #tpu.pipeline_mode<synchronous>, transform_indices = @transform_7, window_bounds = array<i64: 8, 1>}, {pipeline_mode = #tpu.pipeline_mode<synchronous>, transform_indices = @transform_8, window_bounds = array<i64: 8, 512>}]} {
    %c0 = arith.constant 0 : index
    %c0_0 = arith.constant 0 : index
    %0 = vector.load %arg1[%c0, %c0_0] : memref<8x512xf32, #tpu.memory_space<vmem>>, vector<8x512xf32>
    %c0_1 = arith.constant 0 : index
    %c0_2 = arith.constant 0 : index
    %1 = vector.load %arg4[%c0_1, %c0_2] : memref<72x512xf32, #tpu.memory_space<vmem>>, vector<72x512xf32>
    %c0_3 = arith.constant 0 : index
    %c0_4 = arith.constant 0 : index
    %2 = vector.load %arg2[%c0_3, %c0_4] : memref<8x72xf32, #tpu.memory_space<vmem>>, vector<8x72xf32>
    %cst = arith.constant 0.000000e+00 : f32
    %3 = vector.broadcast %cst : f32 to vector<8x17xf32>
    %4 = vector.extract_strided_slice %0 {offsets = [0, 0], sizes = [8, 495], strides = [1, 1]} : vector<8x512xf32> to vector<8x495xf32>
    %5 = tpu.concatenate %3, %4 in 1 : vector<8x17xf32>, vector<8x495xf32> -> vector<8x512xf32>
    %cst_5 = arith.constant 0.000000e+00 : f32
    %6 = vector.broadcast %cst_5 : f32 to vector<8x16xf32>
    %7 = vector.extract_strided_slice %0 {offsets = [0, 0], sizes = [8, 496], strides = [1, 1]} : vector<8x512xf32> to vector<8x496xf32>
    %8 = tpu.concatenate %6, %7 in 1 : vector<8x16xf32>, vector<8x496xf32> -> vector<8x512xf32>
    %cst_6 = arith.constant 0.000000e+00 : f32
    %9 = vector.broadcast %cst_6 : f32 to vector<8x15xf32>
    %10 = vector.extract_strided_slice %0 {offsets = [0, 0], sizes = [8, 497], strides = [1, 1]} : vector<8x512xf32> to vector<8x497xf32>
    %11 = tpu.concatenate %9, %10 in 1 : vector<8x15xf32>, vector<8x497xf32> -> vector<8x512xf32>
    %cst_7 = arith.constant 0.000000e+00 : f32
    %12 = vector.broadcast %cst_7 : f32 to vector<8x1xf32>
    %13 = vector.extract_strided_slice %0 {offsets = [0, 0], sizes = [8, 511], strides = [1, 1]} : vector<8x512xf32> to vector<8x511xf32>
    %14 = tpu.concatenate %12, %13 in 1 : vector<8x1xf32>, vector<8x511xf32> -> vector<8x512xf32>
    %15 = vector.extract_strided_slice %0 {offsets = [0, 1], sizes = [8, 511], strides = [1, 1]} : vector<8x512xf32> to vector<8x511xf32>
    %cst_8 = arith.constant 0.000000e+00 : f32
    %16 = vector.broadcast %cst_8 : f32 to vector<8x1xf32>
    %17 = tpu.concatenate %15, %16 in 1 : vector<8x511xf32>, vector<8x1xf32> -> vector<8x512xf32>
    %18 = vector.extract_strided_slice %0 {offsets = [0, 15], sizes = [8, 497], strides = [1, 1]} : vector<8x512xf32> to vector<8x497xf32>
    %cst_9 = arith.constant 0.000000e+00 : f32
    %19 = vector.broadcast %cst_9 : f32 to vector<8x15xf32>
    %20 = tpu.concatenate %18, %19 in 1 : vector<8x497xf32>, vector<8x15xf32> -> vector<8x512xf32>
    %21 = vector.extract_strided_slice %0 {offsets = [0, 16], sizes = [8, 496], strides = [1, 1]} : vector<8x512xf32> to vector<8x496xf32>
    %cst_10 = arith.constant 0.000000e+00 : f32
    %22 = vector.broadcast %cst_10 : f32 to vector<8x16xf32>
    %23 = tpu.concatenate %21, %22 in 1 : vector<8x496xf32>, vector<8x16xf32> -> vector<8x512xf32>
    %24 = vector.extract_strided_slice %0 {offsets = [0, 17], sizes = [8, 495], strides = [1, 1]} : vector<8x512xf32> to vector<8x495xf32>
    %cst_11 = arith.constant 0.000000e+00 : f32
    %25 = vector.broadcast %cst_11 : f32 to vector<8x17xf32>
    %26 = tpu.concatenate %24, %25 in 1 : vector<8x495xf32>, vector<8x17xf32> -> vector<8x512xf32>
    %27 = tpu.concatenate %5, %8, %11, %14, %0, %17, %20, %23, %26 in 0 : vector<8x512xf32>, vector<8x512xf32>, vector<8x512xf32>, vector<8x512xf32>, vector<8x512xf32>, vector<8x512xf32>, vector<8x512xf32>, vector<8x512xf32>, vector<8x512xf32> -> vector<72x512xf32>
    %28 = arith.mulf %27, %1 : vector<72x512xf32>
    %cst_12 = arith.constant dense<0.000000e+00> : vector<8x512xf32>
    %29 = tpu.matmul %2, %28, %cst_12 {dimension_numbers = #tpu.dot_dimension_numbers<[1], [0], [0], [1], [0, 0, 1, 1], [], []>} : vector<8x72xf32>, vector<72x512xf32>, vector<8x512xf32> -> vector<8x512xf32>
    %cst_13 = arith.constant dense<0.000000e+00> : vector<8xf32>
    %30 = vector.multi_reduction <add>, %29, %cst_13 [1] : vector<8x512xf32> to vector<8xf32>
    %31 = vector.shape_cast %30 : vector<8xf32> to vector<8x1xf32>
    %cst_14 = arith.constant 0.001953125 : f32
    %32 = vector.broadcast %cst_14 : f32 to vector<8x1xf32>
    %33 = arith.mulf %31, %32 : vector<8x1xf32>
    %34 = arith.mulf %29, %29 : vector<8x512xf32>
    %cst_15 = arith.constant dense<0.000000e+00> : vector<8xf32>
    %35 = vector.multi_reduction <add>, %34, %cst_15 [1] : vector<8x512xf32> to vector<8xf32>
    %36 = vector.shape_cast %35 : vector<8xf32> to vector<8x1xf32>
    %cst_16 = arith.constant 0.001953125 : f32
    %37 = vector.broadcast %cst_16 : f32 to vector<8x1xf32>
    %38 = arith.mulf %36, %37 : vector<8x1xf32>
    %39 = arith.mulf %33, %33 : vector<8x1xf32>
    %40 = arith.subf %38, %39 : vector<8x1xf32>
    %cst_17 = arith.constant 0.000000e+00 : f32
    %41 = vector.broadcast %cst_17 : f32 to vector<8x1xf32>
    %42 = arith.maximumf %40, %41 : vector<8x1xf32>
    %c0_18 = arith.constant 0 : index
    %c0_19 = arith.constant 0 : index
    %43 = vector.load %arg5[%c0_18, %c0_19] : memref<8x1xf32, #tpu.memory_space<vmem>>, vector<8x1xf32>
    %cst_20 = arith.constant 9.99999974E-6 : f32
    %44 = vector.broadcast %cst_20 : f32 to vector<8x1xf32>
    %45 = arith.addf %42, %44 : vector<8x1xf32>
    %46 = math.rsqrt %45 : vector<8x1xf32>
    %47 = arith.mulf %43, %46 : vector<8x1xf32>
    %c0_21 = arith.constant 0 : index
    %c0_22 = arith.constant 0 : index
    %48 = vector.load %arg6[%c0_21, %c0_22] : memref<8x1xf32, #tpu.memory_space<vmem>>, vector<8x1xf32>
    %49 = arith.mulf %33, %47 : vector<8x1xf32>
    %50 = arith.subf %48, %49 : vector<8x1xf32>
    %51 = vector.broadcast %47 : vector<8x1xf32> to vector<8x512xf32>
    %52 = arith.mulf %29, %51 : vector<8x512xf32>
    %53 = vector.broadcast %50 : vector<8x1xf32> to vector<8x512xf32>
    %54 = arith.addf %52, %53 : vector<8x512xf32>
    %cst_23 = arith.constant 0.000000e+00 : f32
    %55 = vector.broadcast %cst_23 : f32 to vector<8x512xf32>
    %56 = arith.maximumf %54, %55 : vector<8x512xf32>
    %c0_24 = arith.constant 0 : index
    %c0_25 = arith.constant 0 : index
    %57 = vector.load %arg3[%c0_24, %c0_25] : memref<8x72xf32, #tpu.memory_space<vmem>>, vector<8x72xf32>
    %cst_26 = arith.constant 0.000000e+00 : f32
    %58 = vector.broadcast %cst_26 : f32 to vector<8x17xf32>
    %59 = vector.extract_strided_slice %56 {offsets = [0, 0], sizes = [8, 495], strides = [1, 1]} : vector<8x512xf32> to vector<8x495xf32>
    %60 = tpu.concatenate %58, %59 in 1 : vector<8x17xf32>, vector<8x495xf32> -> vector<8x512xf32>
    %cst_27 = arith.constant 0.000000e+00 : f32
    %61 = vector.broadcast %cst_27 : f32 to vector<8x16xf32>
    %62 = vector.extract_strided_slice %56 {offsets = [0, 0], sizes = [8, 496], strides = [1, 1]} : vector<8x512xf32> to vector<8x496xf32>
    %63 = tpu.concatenate %61, %62 in 1 : vector<8x16xf32>, vector<8x496xf32> -> vector<8x512xf32>
    %cst_28 = arith.constant 0.000000e+00 : f32
    %64 = vector.broadcast %cst_28 : f32 to vector<8x15xf32>
    %65 = vector.extract_strided_slice %56 {offsets = [0, 0], sizes = [8, 497], strides = [1, 1]} : vector<8x512xf32> to vector<8x497xf32>
    %66 = tpu.concatenate %64, %65 in 1 : vector<8x15xf32>, vector<8x497xf32> -> vector<8x512xf32>
    %cst_29 = arith.constant 0.000000e+00 : f32
    %67 = vector.broadcast %cst_29 : f32 to vector<8x1xf32>
    %68 = vector.extract_strided_slice %56 {offsets = [0, 0], sizes = [8, 511], strides = [1, 1]} : vector<8x512xf32> to vector<8x511xf32>
    %69 = tpu.concatenate %67, %68 in 1 : vector<8x1xf32>, vector<8x511xf32> -> vector<8x512xf32>
    %70 = vector.extract_strided_slice %56 {offsets = [0, 1], sizes = [8, 511], strides = [1, 1]} : vector<8x512xf32> to vector<8x511xf32>
    %cst_30 = arith.constant 0.000000e+00 : f32
    %71 = vector.broadcast %cst_30 : f32 to vector<8x1xf32>
    %72 = tpu.concatenate %70, %71 in 1 : vector<8x511xf32>, vector<8x1xf32> -> vector<8x512xf32>
    %73 = vector.extract_strided_slice %56 {offsets = [0, 15], sizes = [8, 497], strides = [1, 1]} : vector<8x512xf32> to vector<8x497xf32>
    %cst_31 = arith.constant 0.000000e+00 : f32
    %74 = vector.broadcast %cst_31 : f32 to vector<8x15xf32>
    %75 = tpu.concatenate %73, %74 in 1 : vector<8x497xf32>, vector<8x15xf32> -> vector<8x512xf32>
    %76 = vector.extract_strided_slice %56 {offsets = [0, 16], sizes = [8, 496], strides = [1, 1]} : vector<8x512xf32> to vector<8x496xf32>
    %cst_32 = arith.constant 0.000000e+00 : f32
    %77 = vector.broadcast %cst_32 : f32 to vector<8x16xf32>
    %78 = tpu.concatenate %76, %77 in 1 : vector<8x496xf32>, vector<8x16xf32> -> vector<8x512xf32>
    %79 = vector.extract_strided_slice %56 {offsets = [0, 17], sizes = [8, 495], strides = [1, 1]} : vector<8x512xf32> to vector<8x495xf32>
    %cst_33 = arith.constant 0.000000e+00 : f32
    %80 = vector.broadcast %cst_33 : f32 to vector<8x17xf32>
    %81 = tpu.concatenate %79, %80 in 1 : vector<8x495xf32>, vector<8x17xf32> -> vector<8x512xf32>
    %82 = tpu.concatenate %60, %63, %66, %69, %56, %72, %75, %78, %81 in 0 : vector<8x512xf32>, vector<8x512xf32>, vector<8x512xf32>, vector<8x512xf32>, vector<8x512xf32>, vector<8x512xf32>, vector<8x512xf32>, vector<8x512xf32>, vector<8x512xf32> -> vector<72x512xf32>
    %83 = arith.mulf %82, %1 : vector<72x512xf32>
    %cst_34 = arith.constant dense<0.000000e+00> : vector<8x512xf32>
    %84 = tpu.matmul %57, %83, %cst_34 {dimension_numbers = #tpu.dot_dimension_numbers<[1], [0], [0], [1], [0, 0, 1, 1], [], []>} : vector<8x72xf32>, vector<72x512xf32>, vector<8x512xf32> -> vector<8x512xf32>
    %cst_35 = arith.constant dense<0.000000e+00> : vector<8xf32>
    %85 = vector.multi_reduction <add>, %84, %cst_35 [1] : vector<8x512xf32> to vector<8xf32>
    %86 = vector.shape_cast %85 : vector<8xf32> to vector<8x1xf32>
    %cst_36 = arith.constant 0.001953125 : f32
    %87 = vector.broadcast %cst_36 : f32 to vector<8x1xf32>
    %88 = arith.mulf %86, %87 : vector<8x1xf32>
    %89 = arith.mulf %84, %84 : vector<8x512xf32>
    %cst_37 = arith.constant dense<0.000000e+00> : vector<8xf32>
    %90 = vector.multi_reduction <add>, %89, %cst_37 [1] : vector<8x512xf32> to vector<8xf32>
    %91 = vector.shape_cast %90 : vector<8xf32> to vector<8x1xf32>
    %cst_38 = arith.constant 0.001953125 : f32
    %92 = vector.broadcast %cst_38 : f32 to vector<8x1xf32>
    %93 = arith.mulf %91, %92 : vector<8x1xf32>
    %94 = arith.mulf %88, %88 : vector<8x1xf32>
    %95 = arith.subf %93, %94 : vector<8x1xf32>
    %cst_39 = arith.constant 0.000000e+00 : f32
    %96 = vector.broadcast %cst_39 : f32 to vector<8x1xf32>
    %97 = arith.maximumf %95, %96 : vector<8x1xf32>
    %c0_40 = arith.constant 0 : index
    %c0_41 = arith.constant 0 : index
    %98 = vector.load %arg7[%c0_40, %c0_41] : memref<8x1xf32, #tpu.memory_space<vmem>>, vector<8x1xf32>
    %cst_42 = arith.constant 9.99999974E-6 : f32
    %99 = vector.broadcast %cst_42 : f32 to vector<8x1xf32>
    %100 = arith.addf %97, %99 : vector<8x1xf32>
    %101 = math.rsqrt %100 : vector<8x1xf32>
    %102 = arith.mulf %98, %101 : vector<8x1xf32>
    %c0_43 = arith.constant 0 : index
    %c0_44 = arith.constant 0 : index
    %103 = vector.load %arg8[%c0_43, %c0_44] : memref<8x1xf32, #tpu.memory_space<vmem>>, vector<8x1xf32>
    %104 = arith.mulf %88, %102 : vector<8x1xf32>
    %105 = arith.subf %103, %104 : vector<8x1xf32>
    %106 = vector.broadcast %102 : vector<8x1xf32> to vector<8x512xf32>
    %107 = arith.mulf %84, %106 : vector<8x512xf32>
    %108 = vector.broadcast %105 : vector<8x1xf32> to vector<8x512xf32>
    %109 = arith.addf %107, %108 : vector<8x512xf32>
    %110 = arith.addf %109, %0 : vector<8x512xf32>
    %cst_45 = arith.constant 0.000000e+00 : f32
    %111 = vector.broadcast %cst_45 : f32 to vector<8x512xf32>
    %112 = arith.maximumf %110, %111 : vector<8x512xf32>
    %c0_46 = arith.constant 0 : index
    %c0_47 = arith.constant 0 : index
    %113 = vector.load %arg9[%c0_46, %c0_47] : memref<8x512xf32, #tpu.memory_space<vmem>>, vector<8x512xf32>
    tpu.vector_store %arg9[%c0_46, %c0_47], %112 {strides = array<i32>} : memref<8x512xf32, #tpu.memory_space<vmem>>, vector<8x512xf32>,
    return
  }
  func.func @transform_0(%arg0: i32) -> (i32, i32) {
    %c0_i32 = arith.constant 0 : i32
    %c0_i32_0 = arith.constant 0 : i32
    %c0_i32_1 = arith.constant 0 : i32
    return %c0_i32, %c0_i32_0 : i32, i32
  }
  func.func @transform_1(%arg0: i32) -> (i32, i32) {
    %c0_i32 = arith.constant 0 : i32
    %c0_i32_0 = arith.constant 0 : i32
    %c0_i32_1 = arith.constant 0 : i32
    return %c0_i32, %c0_i32_0 : i32, i32
  }
  func.func @transform_2(%arg0: i32) -> (i32, i32) {
    %c0_i32 = arith.constant 0 : i32
    %c0_i32_0 = arith.constant 0 : i32
    %c0_i32_1 = arith.constant 0 : i32
    return %c0_i32, %c0_i32_0 : i32, i32
  }
  func.func @transform_3(%arg0: i32) -> (i32, i32) {
    %c0_i32 = arith.constant 0 : i32
    %c0_i32_0 = arith.constant 0 : i32
    %c0_i32_1 = arith.constant 0 : i32
    return %c0_i32, %c0_i32_0 : i32, i32
  }
  func.func @transform_4(%arg0: i32) -> (i32, i32) {
    %c0_i32 = arith.constant 0 : i32
    %c0_i32_0 = arith.constant 0 : i32
    %c0_i32_1 = arith.constant 0 : i32
    return %c0_i32, %c0_i32_0 : i32, i32
  }
  func.func @transform_5(%arg0: i32) -> (i32, i32) {
    %c0_i32 = arith.constant 0 : i32
    %c0_i32_0 = arith.constant 0 : i32
    %c0_i32_1 = arith.constant 0 : i32
    return %c0_i32, %c0_i32_0 : i32, i32
  }
  func.func @transform_6(%arg0: i32) -> (i32, i32) {
    %c0_i32 = arith.constant 0 : i32
    %c0_i32_0 = arith.constant 0 : i32
    %c0_i32_1 = arith.constant 0 : i32
    return %c0_i32, %c0_i32_0 : i32, i32
  }
  func.func @transform_7(%arg0: i32) -> (i32, i32) {
    %c0_i32 = arith.constant 0 : i32
    %c0_i32_0 = arith.constant 0 : i32
    %c0_i32_1 = arith.constant 0 : i32
    return %c0_i32, %c0_i32_0 : i32, i32
  }
  func.func @transform_8(%arg0: i32) -> (i32, i32) {
    %c0_i32 = arith.constant 0 : i32
    %c0_i32_0 = arith.constant 0 : i32
    %c0_i32_1 = arith.constant 0 : i32
    return %c0_i32, %c0_i32_0 : i32, i32
  }
}

</mosaic_0001>

<bundles_post_ra>
// kernel: residual_block_forward.1
= control target key start
LH: loop header
LB: loop body
LE: loop exit
PB: predicated region body
PF: predicated region fallthrough
CT: control target
= control target key end

     0   :  { %s834_s9 = smov 111   ;;  %s835_s12 = smov 112   ;;  %v841_v4 = vmov 0.0   ;;  %vm201_vm0 = vcmask 908288   ;;  %vm184_vm1 = vcmask 916480   ;;  %vm167_vm2 = vcmask 924672   ;;  %s1411_s0 = inlined_call_operand.vmem [shape: f32[8,512], index: 0, kind: input, shape index: {}]   ;;  %s1412_s3 = inlined_call_operand.vmem [shape: f32[72,512], index: 3, kind: input, shape index: {}]   ;;  %s1413_s1 = inlined_call_operand.vmem [shape: f32[8,72], index: 1, kind: input, shape index: {}]   ;;  %s1414_s4 = inlined_call_operand.vmem [shape: f32[8,1], index: 4, kind: input, shape index: {}]   ;;  %s1415_s5 = inlined_call_operand.vmem [shape: f32[8,1], index: 5, kind: input, shape index: {}]   ;;  %s1416_s2 = inlined_call_operand.vmem [shape: f32[8,72], index: 2, kind: input, shape index: {}]   ;;  %s1417_s6 = inlined_call_operand.vmem [shape: f32[8,1], index: 6, kind: input, shape index: {}]   ;;  %s1418_s7 = inlined_call_operand.vmem [shape: f32[8,1], index: 7, kind: input, shape index: {}]   ;;  %s1419_s8 = inlined_call_operand.vmem [shape: f32[8,512], index: 8, kind: output, shape index: {}]  }
   0x1   :  { %v892_v0 = vld [vmem:[%s1411_s0 + $0x8] sm:$0xff]  ;;  %v897_v1 = vld [vmem:[%s1411_s0] sm:$0xff]  ;;  %v906_v2 = vld [vmem:[%s1411_s0 + $0x10] sm:$0xff]  ;;  %s836_s13 = smov 113   ;;  %s837_s16 = smov 127   ;;  %314 = vmatprep.mubr.f32.mxu0 %v841_v4  ;;  %385 = vmatprep.mubr.f32.mxu1 %v841_v4  ;;  %vm150_vm3 = vcmask 1039360  }
   0x2   :  { %195 = vrot.lane.b32.xlu0 %v892_v0, %s834_s9  ;;  %193 = vrot.lane.b32.xlu1 %v897_v1, %s834_s9  ;;  %v923_v3 = vld [vmem:[%s1411_s0 + $0x18] sm:$0xff]  ;;  %s838_s0 = smov 1   ;;  %s839_s17 = smov 15   ;;  %v978_v7 = vld [vmem:[%s1412_s3 + $0x108] sm:$0xff]  ;;  %vm133_vm4 = vcmask 7168   ;;  %vm116_vm5 = vcmask 121856  }
   0x3   :  { %s840_s18 = smov 16   ;;  %s842_s19 = smov 17   ;;  %v984_v11 = vld [vmem:[%s1412_s3 + $0x100] sm:$0xff]  ;;  %v991_v14 = vld [vmem:[%s1412_s3 + $0xe8] sm:$0xff]  ;;  %v1018_v29 = vld [vmem:[%s1412_s3 + $0x118] sm:$0xff]  ;;  %vm99_vm6 = vcmask 130048  }
   0x4   :  { %v996_v15 = vld [vmem:[%s1412_s3 + $0xe0] sm:$0xff]  ;;  %v1006_v23 = vld [vmem:[%s1412_s3 + $0xc8] sm:$0xff]  ;;  %v1023_v30 = vld [vmem:[%s1412_s3 + $0x110] sm:$0xff]  ;;  %vm82_vm7 = vcmask 138240   ;;  %vm246_vm8 = vcmask 588800  }
   0x5   :  { %v1013_v28 = vld [vmem:[%s1412_s3 + $0xc0] sm:$0xff]  ;;  %v1034_v39 = vld [vmem:[%s1412_s3 + $0xa8] sm:$0xff]  ;;  %v1041_v44 = vld [vmem:[%s1412_s3 + $0xf0] sm:$0xff] }
   0x6   :  { %197 = vrot.lane.b32.xlu0 %v906_v2, %s834_s9  ;;  %178 = vrot.lane.b32.xlu1 %v892_v0, %s835_s12  ;;  %v1046_v45 = vld [vmem:[%s1412_s3 + $0x88] sm:$0xff]  ;;  %v1051_v46 = vld [vmem:[%s1412_s3 + $0xf8] sm:$0xff] }
   0x7   :  { %v1056_v47 = vld [vmem:[%s1412_s3 + $0xa0] sm:$0xff]  ;;  %v227_v54 = vmul.f32 %v1046_v45, %v892_v0  ;;  %v1076_v59 = vld [vmem:[%s1412_s3 + $0xd0] sm:$0xff]  ;;  %v1081_v60 = vld [vmem:[%s1412_s3 + $0xd8] sm:$0xff] }
   0x8   :  { %v1061_v48 = vld [vmem:[%s1412_s3 + $0x80] sm:$0xff] }
   0x9   :  { %v226_v58 = vmul.f32 %v1061_v48, %v897_v1 }
   0xa   :  { %180 = vrot.lane.b32.xlu0 %v906_v2, %s835_s12  ;;  %176 = vrot.lane.b32.xlu1 %v897_v1, %s835_s12 }
   0xe   :  { %161 = vrot.lane.b32.xlu0 %v892_v0, %s836_s13  ;;  %163 = vrot.lane.b32.xlu1 %v906_v2, %s836_s13 }
  0x12   :  { %199 = vrot.lane.b32.xlu0 %v923_v3, %s834_s9  ;;  %159 = vrot.lane.b32.xlu1 %v897_v1, %s836_s13 }
  0x16   :  { %144 = vrot.lane.b32.xlu0 %v892_v0, %s837_s16  ;;  %146 = vrot.lane.b32.xlu1 %v906_v2, %s837_s16 }
  0x1a   :  { %182 = vrot.lane.b32.xlu0 %v923_v3, %s835_s12  ;;  %142 = vrot.lane.b32.xlu1 %v897_v1, %s837_s16 }
  0x1e   :  { %165 = vrot.lane.b32.xlu0 %v923_v3, %s836_s13  ;;  %125 = vrot.lane.b32.xlu1 %v897_v1, %s838_s0 }
  0x22   :  { %127 = vrot.lane.b32.xlu0 %v892_v0, %s838_s0  ;;  %148 = vrot.lane.b32.xlu1 %v923_v3, %s837_s16 }
  0x26   :  { %108 = vrot.lane.b32.xlu0 %v897_v1, %s839_s17  ;;  %110 = vrot.lane.b32.xlu1 %v892_v0, %s839_s17 }
  0x2a   :  { %91 = vrot.lane.b32.xlu0 %v897_v1, %s840_s18  ;;  %93 = vrot.lane.b32.xlu1 %v892_v0, %s840_s18 }
  0x2e   :  { %129 = vrot.lane.b32.xlu0 %v906_v2, %s838_s0  ;;  %131 = vrot.lane.b32.xlu1 %v923_v3, %s838_s0 }
  0x32   :  { %74 = vrot.lane.b32.xlu0 %v897_v1, %s842_s19  ;;  %76 = vrot.lane.b32.xlu1 %v892_v0, %s842_s19 }
  0x36   :  { %112 = vrot.lane.b32.xlu0 %v906_v2, %s839_s17  ;;  %114 = vrot.lane.b32.xlu1 %v923_v3, %s839_s17 }
  0x3a   :  { %95 = vrot.lane.b32.xlu0 %v906_v2, %s840_s18  ;;  %97 = vrot.lane.b32.xlu1 %v923_v3, %s840_s18 }
  0x3e   :  { %78 = vrot.lane.b32.xlu0 %v906_v2, %s842_s19  ;;  %80 = vrot.lane.b32.xlu1 %v923_v3, %s842_s19 }
  0x74   :  { %v196_v5 = vpop.permute.xlu0 %195  ;;  %v194_v6 = vpop.permute.xlu1 %193 }
  0x75   :  { %v202_v8 = vsel %vm201_vm0, %v194_v6, %v196_v5 }
  0x76   :  { %v242_v16 = vmul.f32 %v202_v8, %v984_v11 }
  0x78   :  { %v198_v9 = vpop.permute.xlu0 %197  ;;  %v179_v10 = vpop.permute.xlu1 %178 }
  0x79   :  { %v203_v12 = vsel %vm201_vm0, %v196_v5, %v198_v9 }
  0x7a   :  { %v243_v13 = vmul.f32 %v203_v12, %v978_v7  ;;  %v1100_v12 = vld [vmem:[%s1412_s3 + $0xb8] sm:$0xff] }
  0x7c   :  { %264 = vmatprep.subr.mxu0 %v243_v13  ;;  %v181_v17 = vpop.permute.xlu0 %180  ;;  %v177_v18 = vpop.permute.xlu1 %176  ;;  %v1105_v13 = vld [vmem:[%s1412_s3 + $0x98] sm:$0xff] }
  0x7d   :  { %v186_v19 = vsel %vm184_vm1, %v179_v10, %v181_v17  ;;  %v185_v20 = vsel %vm184_vm1, %v177_v18, %v179_v10  ;;  %265 = vmatpush1.msra.mxu0 %v242_v16  ;;  %v1095_v10 = vld [vmem:[%s1412_s3 + $0xb0] sm:$0xff]  ;;  %v1110_v16 = vld [vmem:[%s1412_s3 + $0x60] sm:$0xff] }
  0x7e   :  { %v239_v21 = vmul.f32 %v186_v19, %v991_v14  ;;  %v238_v22 = vmul.f32 %v185_v20, %v996_v15  ;;  %v1116_v20 = vld [vmem:[%s1412_s3 + $0x90] sm:$0xff] }
  0x80   :  { %v162_v24 = vpop.permute.xlu0 %161  ;;  %266 = vmatprep.subr.mxu0 %v239_v21  ;;  %v164_v25 = vpop.permute.xlu1 %163 }
  0x81   :  { %v169_v26 = vsel %vm167_vm2, %v162_v24, %v164_v25  ;;  %267 = vmatpush1.msra.mxu0 %v238_v22 }
  0x82   :  { %v235_v27 = vmul.f32 %v169_v26, %v1006_v23 }
  0x84   :  { %v200_v31 = vpop.permute.xlu0 %199  ;;  %268 = vmatprep.subr.mxu0 %v235_v27  ;;  %v160_v32 = vpop.permute.xlu1 %159 }
  0x85   :  { %v204_v33 = vsel %vm201_vm0, %v198_v9, %v200_v31  ;;  %v168_v34 = vsel %vm167_vm2, %v160_v32, %v162_v24  ;;  %v209_v35 = vsel %vm201_vm0, %v200_v31, 0.0  ;;  %v1090_v9 = vld [vmem:[%s1412_s3 + $0x68] sm:$0xff]  ;;  %v229_v31 = vmul.f32 %v1105_v13, %v923_v3 }
  0x86   :  { %v234_v36 = vmul.f32 %v168_v34, %v1013_v28  ;;  %v245_v37 = vmul.f32 %v209_v35, %v1018_v29  ;;  %v244_v38 = vmul.f32 %v204_v33, %v1023_v30  ;;  %v1130_v33 = vld [vmem:[%s1412_s3 + $0x40] sm:$0xff]  ;;  %v1135_v34 = vld [vmem:[%s1412_s3 + $0x48] sm:$0xff]  ;;  %v228_v35 = vmul.f32 %v1116_v20, %v906_v2 }
  0x88   :  { %335 = vmatprep.subr.mxu1 %v245_v37  ;;  %v145_v40 = vpop.permute.xlu0 %144  ;;  %269 = vmatpush1.msra.mxu0 %v234_v36  ;;  %v147_v41 = vpop.permute.xlu1 %146 }
  0x89   :  { %v152_v42 = vsel %vm150_vm3, %v145_v40, %v147_v41  ;;  %336 = vmatpush1.msra.mxu1 %v244_v38 }
  0x8a   :  { %v231_v43 = vmul.f32 %v152_v42, %v1034_v39 }
  0x8c   :  { %v183_v49 = vpop.permute.xlu0 %182  ;;  %270 = vmatprep.subr.mxu0 %v231_v43  ;;  %v143_v50 = vpop.permute.xlu1 %142  ;;  %v1146_v43 = vld [vmem:[%s1412_s3 + $0x20] sm:$0xff] }
  0x8d   :  { %v187_v51 = vsel %vm184_vm1, %v181_v17, %v183_v49  ;;  %v192_v52 = vsel %vm184_vm1, %v183_v49, 0.0  ;;  %v151_v53 = vsel %vm150_vm3, %v143_v50, %v145_v40  ;;  %v1151_v49 = vld [vmem:[%s1412_s3 + $0x28] sm:$0xff] }
  0x8e   :  { %v240_v55 = vmul.f32 %v187_v51, %v1041_v44  ;;  %v241_v56 = vmul.f32 %v192_v52, %v1051_v46  ;;  %v230_v57 = vmul.f32 %v151_v53, %v1056_v47 }
  0x90   :  { %337 = vmatprep.subr.mxu1 %v241_v56  ;;  %v166_v61 = vpop.permute.xlu0 %165  ;;  %271 = vmatpush1.msra.mxu0 %v230_v57  ;;  %v126_v62 = vpop.permute.xlu1 %125  ;;  %v1160_v56 = vld [vmem:[%s1412_s3 + $0x70] sm:$0xff]  ;;  %v1165_v57 = vld [vmem:[%s1412_s3 + $0x78] sm:$0xff] }
  0x91   :  { %v170_v63 = vsel %vm167_vm2, %v164_v25, %v166_v61  ;;  %v175_v5 = vsel %vm167_vm2, %v166_v61, 0.0  ;;  %338 = vmatpush1.msra.mxu1 %v240_v55  ;;  %272 = vmatprep.subr.mxu0 %v227_v54  ;;  %v141_v17 = vsel %vm133_vm4, 0.0, %v126_v62 }
  0x92   :  { %v236_v6 = vmul.f32 %v170_v63, %v1076_v59  ;;  %v237_v8 = vmul.f32 %v175_v5, %v1081_v60  ;;  %273 = vmatpush1.msra.mxu0 %v226_v58  ;;  %v222_v32 = vmul.f32 %v141_v17, %v1110_v16  ;;  %v1179_v17 = vld [vmem:[%s1412_s3 + $0x8] sm:$0xff] }
  0x94   :  { %339 = vmatprep.subr.mxu1 %v237_v8  ;;  %v128_v18 = vpop.permute.xlu0 %127  ;;  %v149_v19 = vpop.permute.xlu1 %148  ;;  %v1174_v8 = vld [vmem:[%s1412_s3] sm:$0xff] }
  0x95   :  { %v134_v21 = vsel %vm133_vm4, %v126_v62, %v128_v18  ;;  %v153_v22 = vsel %vm150_vm3, %v147_v41, %v149_v19  ;;  %v158_v24 = vsel %vm150_vm3, %v149_v19, 0.0  ;;  %340 = vmatpush1.msra.mxu1 %v236_v6 }
  0x96   :  { %v223_v25 = vmul.f32 %v134_v21, %v1090_v9  ;;  %v232_v26 = vmul.f32 %v153_v22, %v1095_v10  ;;  %v233_v27 = vmul.f32 %v158_v24, %v1100_v12 }
  0x98   :  { %v109_v36 = vpop.permute.xlu0 %108  ;;  %341 = vmatprep.subr.mxu1 %v233_v27  ;;  %v111_v37 = vpop.permute.xlu1 %110  ;;  %274 = vmatprep.subr.mxu0 %v223_v25  ;;  %v1193_v27 = vld [vmem:[%s1412_s3 + $0x58] sm:$0xff] }
  0x99   :  { %v124_v38 = vsel %vm116_vm5, 0.0, %v109_v36  ;;  %v117_v40 = vsel %vm116_vm5, %v109_v36, %v111_v37  ;;  %275 = vmatpush1.msra.mxu0 %v222_v32  ;;  %342 = vmatpush1.msra.mxu1 %v232_v26  ;;  %v1188_v26 = vld [vmem:[%s1412_s3 + $0x50] sm:$0xff] }
  0x9a   :  { %v218_v41 = vmul.f32 %v124_v38, %v1130_v33  ;;  %v219_v42 = vmul.f32 %v117_v40, %v1135_v34  ;;  %343 = vmatprep.subr.mxu1 %v229_v31  ;;  %v69_v31 = vld [vmem:[%s1413_s1] sm:$0xff] }
  0x9b   :  { %344 = vmatpush1.msra.mxu1 %v228_v35 }
  0x9c   :  { %v92_v50 = vpop.permute.xlu0 %91  ;;  %v94_v51 = vpop.permute.xlu1 %93  ;;  %276 = vmatprep.subr.mxu0 %v219_v42  ;;  %v1206_v42 = vld [vmem:[%s1412_s3 + $0x30] sm:$0xff] }
  0x9d   :  { %v107_v52 = vsel %vm99_vm6, 0.0, %v92_v50  ;;  %v100_v53 = vsel %vm99_vm6, %v92_v50, %v94_v51  ;;  %277 = vmatpush1.msra.mxu0 %v218_v41  ;;  %v1211_v50 = vld [vmem:[%s1412_s3 + $0x38] sm:$0xff] }
  0x9e   :  { %v214_v54 = vmul.f32 %v107_v52, %v1146_v43  ;;  %v215_v55 = vmul.f32 %v100_v53, %v1151_v49 }
  0xa0   :  { %v130_v58 = vpop.permute.xlu0 %129  ;;  %v132_v61 = vpop.permute.xlu1 %131  ;;  %278 = vmatprep.subr.mxu0 %v215_v55 }
  0xa1   :  { %v135_v62 = vsel %vm133_vm4, %v128_v18, %v130_v58  ;;  %v136_v63 = vsel %vm133_vm4, %v130_v58, %v132_v61  ;;  %279 = vmatpush1.msra.mxu0 %v214_v54  ;;  %v1221_v61 = vld [vmem:[%s1412_s3 + $0x10] sm:$0xff] }
  0xa2   :  { %v224_v5 = vmul.f32 %v135_v62, %v1160_v56  ;;  %v225_v6 = vmul.f32 %v136_v63, %v1165_v57  ;;  %v1226_v62 = vld [vmem:[%s1412_s3 + $0x18] sm:$0xff] }
  0xa4   :  { %v75_v19 = vpop.permute.xlu0 %74  ;;  %345 = vmatprep.subr.mxu1 %v225_v6  ;;  %v77_v18 = vpop.permute.xlu1 %76 }
  0xa5   :  { %v90_v21 = vsel %vm82_vm7, 0.0, %v75_v19  ;;  %v83_v22 = vsel %vm82_vm7, %v75_v19, %v77_v18  ;;  %346 = vmatpush1.msra.mxu1 %v224_v5 }
  0xa6   :  { %v210_v24 = vmul.f32 %v90_v21, %v1174_v8  ;;  %v211_v25 = vmul.f32 %v83_v22, %v1179_v17 }
  0xa8   :  { %v113_v32 = vpop.permute.xlu0 %112  ;;  %v115_v35 = vpop.permute.xlu1 %114  ;;  %280 = vmatprep.subr.mxu0 %v211_v25 }
  0xa9   :  { %v118_v36 = vsel %vm116_vm5, %v111_v37, %v113_v32  ;;  %v119_v38 = vsel %vm116_vm5, %v113_v32, %v115_v35  ;;  %281 = vmatpush1.msra.mxu0 %v210_v24 }
  0xaa   :  { %v220_v40 = vmul.f32 %v118_v36, %v1188_v26  ;;  %v221_v41 = vmul.f32 %v119_v38, %v1193_v27  ;;  %814 = vmatmul.mubr.msk.f32.vlgmr.msra.gmra.mxu0 %vm246_vm8, %v69_v31 }
  0xab   :  { %676 = vmatprep.mubr.f32.mxu0 %v841_v4 }
  0xac   :  { %v96_v37 = vpop.permute.xlu0 %95  ;;  %347 = vmatprep.subr.mxu1 %v221_v41  ;;  %v98_v52 = vpop.permute.xlu1 %97 }
  0xad   :  { %v101_v53 = vsel %vm99_vm6, %v94_v51, %v96_v37  ;;  %v102_v54 = vsel %vm99_vm6, %v96_v37, %v98_v52  ;;  %348 = vmatpush1.msra.mxu1 %v220_v40 }
  0xae   :  { %v216_v55 = vmul.f32 %v101_v53, %v1206_v42  ;;  %v217_v58 = vmul.f32 %v102_v54, %v1211_v50 }
  0xb0   :  { %v79_v63 = vpop.permute.xlu0 %78  ;;  %349 = vmatprep.subr.mxu1 %v217_v58  ;;  %v81_v51 = vpop.permute.xlu1 %80 }
  0xb1   :  { %v84_v5 = vsel %vm82_vm7, %v77_v18, %v79_v63  ;;  %v85_v6 = vsel %vm82_vm7, %v79_v63, %v81_v51  ;;  %350 = vmatpush1.msra.mxu1 %v216_v55  ;;  %v843_v55 = vmov 0  }
  0xb2   :  { %v212_v19 = vmul.f32 %v84_v5, %v1221_v61  ;;  %v213_v21 = vmul.f32 %v85_v6, %v1226_v62  ;;  %828 = vset.pattern.permute.xlu0 %v843_v55  ;;  %829 = vset.pattern.permute.xlu1 %v843_v55 }
  0xb4   :  { %351 = vmatprep.subr.mxu1 %v213_v21  ;;  %v411_v21 = vld [vmem:[%s1414_s4] sm:$0xff] }
  0xb5   :  { %352 = vmatpush1.msra.mxu1 %v212_v19 }
  0xb6   :  { %815 = vmatmul.mubr.msk.f32.vlgmr.msra.gmra.mxu1 %vm246_vm8, %v69_v31 }
  0xb7   :  { %747 = vmatprep.mubr.f32.mxu1 %v841_v4 }
 0x16a   :  { %v316_v22 = vpop.f32.mrf.mxu0 }
 0x16b   :  { %v398_v25 = vmul.f32 %v316_v22, %v316_v22 }
 0x16c   :  { %v318_v24 = vpop.f32.mrf.mxu0 }
 0x16d   :  { %v399_v32 = vmul.f32 %v318_v24, %v318_v24  ;;  %v392_v35 = vadd.f32 %v318_v24, %v316_v22 }
 0x16f   :  { %v402_v40 = vadd.f32 %v399_v32, %v398_v25 }
 0x176   :  { %v387_v36 = vpop.f32.mrf.mxu1 }
 0x177   :  { %v400_v18 = vmul.f32 %v387_v36, %v387_v36  ;;  %v393_v38 = vadd.f32 %v392_v35, %v387_v36  ;;  %v415_v35 = vld [vmem:[%s1415_s5] sm:$0xff] }
 0x178   :  { %v389_v41 = vpop.f32.mrf.mxu1 }
 0x179   :  { %v394_v37 = vadd.f32 %v393_v38, %v389_v41  ;;  %v401_v52 = vmul.f32 %v389_v41, %v389_v41  ;;  %v403_v53 = vadd.f32 %v402_v40, %v400_v18 }
 0x17b   :  { %395 = vadd.xlane.f32.xlu0 %v394_v37  ;;  %v404_v54 = vadd.f32 %v403_v53, %v401_v52 }
 0x17d   :  { %405 = vadd.xlane.f32.xlu1 %v404_v54 }
 0x204   :  { %v396_v4 = vpop.xlane.xlu0 %395 }
 0x205   :  { %v397_v31 = vmul.f32 0.001953125, %v396_v4 }
 0x206   :  { %v406_v58 = vpop.xlane.xlu1 %405 }
 0x207   :  { %v408_v63 = vmul.f32 %v397_v31, %v397_v31  ;;  %v407_v51 = vmul.f32 0.001953125, %v406_v58 }
 0x209   :  { %v409_v5 = vsub.f32 %v407_v51, %v408_v63 }
 0x20b   :  { %v410_v6 = vmax.f32 %v409_v5, 0.0 }
 0x20d   :  { %v412_v19 = vadd.f32 1e-05, %v410_v6 }
 0x20f   :  { %830 = vrsqrt.f32 %v412_v19 }
 0x21c   :  { %v831_v25 = vpop.eup %830 }
 0x21d   :  { %v414_v32 = vmul.f32 %v831_v25, %v411_v21 }
 0x21f   :  { %420 = vperm.xlu0 %828, %v414_v32   ;;  %v416_v18 = vmul.f32 %v414_v32, %v397_v31 }
 0x221   :  { %v417_v38 = vsub.f32 %v415_v35, %v416_v18 }
 0x223   :  { %429 = vperm.xlu1 %829, %v417_v38  }
 0x29a   :  { %v421_v40 = vpop.permute.xlu0 %420 }
 0x29b   :  { %v424_v37 = vmul.f32 %v421_v40, %v318_v24  ;;  %v425_v53 = vmul.f32 %v421_v40, %v387_v36  ;;  %v426_v54 = vmul.f32 %v421_v40, %v389_v41  ;;  %v423_v51 = vmul.f32 %v421_v40, %v316_v22 }
 0x29e   :  { %v430_v52 = vpop.permute.xlu1 %429 }
 0x29f   :  { %v433_v55 = vadd.f32 %v430_v52, %v424_v37  ;;  %v434_v4 = vadd.f32 %v430_v52, %v425_v53  ;;  %v435_v58 = vadd.f32 %v430_v52, %v426_v54  ;;  %v432_v31 = vadd.f32 %v430_v52, %v423_v51 }
 0x2a1   :  { %v1240_v63 = vmax.f32 %v433_v55, 0.0  ;;  %v1246_v5 = vmax.f32 %v434_v4, 0.0  ;;  %v1248_v6 = vmax.f32 %v435_v58, 0.0  ;;  %v1254_v24 = vmax.f32 %v432_v31, 0.0 }
 0x2a3   :  { %527 = vrot.lane.b32.xlu0 %v1240_v63, %s836_s13  ;;  %559 = vrot.lane.b32.xlu1 %v1240_v63, %s834_s9 }
 0x2a7   :  { %563 = vrot.lane.b32.xlu0 %v1248_v6, %s834_s9  ;;  %561 = vrot.lane.b32.xlu1 %v1246_v5, %s834_s9 }
 0x2ab   :  { %511 = vrot.lane.b32.xlu0 %v1240_v63, %s837_s16  ;;  %557 = vrot.lane.b32.xlu1 %v1254_v24, %s834_s9 }
 0x2af   :  { %547 = vrot.lane.b32.xlu0 %v1248_v6, %s835_s12  ;;  %543 = vrot.lane.b32.xlu1 %v1240_v63, %s835_s12 }
 0x2b3   :  { %531 = vrot.lane.b32.xlu0 %v1248_v6, %s836_s13  ;;  %545 = vrot.lane.b32.xlu1 %v1246_v5, %s835_s12 }
 0x2b7   :  { %495 = vrot.lane.b32.xlu0 %v1240_v63, %s838_s0  ;;  %541 = vrot.lane.b32.xlu1 %v1254_v24, %s835_s12 }
 0x2bb   :  { %477 = vrot.lane.b32.xlu0 %v1254_v24, %s839_s17  ;;  %529 = vrot.lane.b32.xlu1 %v1246_v5, %s836_s13 }
 0x2bf   :  { %461 = vrot.lane.b32.xlu0 %v1254_v24, %s840_s18  ;;  %525 = vrot.lane.b32.xlu1 %v1254_v24, %s836_s13 }
 0x2c3   :  { %497 = vrot.lane.b32.xlu0 %v1246_v5, %s838_s0  ;;  %513 = vrot.lane.b32.xlu1 %v1246_v5, %s837_s16 }
 0x2c7   :  { %445 = vrot.lane.b32.xlu0 %v1254_v24, %s842_s19  ;;  %509 = vrot.lane.b32.xlu1 %v1254_v24, %s837_s16 }
 0x2cb   :  { %481 = vrot.lane.b32.xlu0 %v1246_v5, %s839_s17  ;;  %493 = vrot.lane.b32.xlu1 %v1254_v24, %s838_s0 }
 0x2cf   :  { %465 = vrot.lane.b32.xlu0 %v1246_v5, %s840_s18  ;;  %515 = vrot.lane.b32.xlu1 %v1248_v6, %s837_s16 }
 0x2d3   :  { %449 = vrot.lane.b32.xlu0 %v1246_v5, %s842_s19  ;;  %479 = vrot.lane.b32.xlu1 %v1240_v63, %s839_s17 }
 0x2d7   :  { %463 = vrot.lane.b32.xlu1 %v1240_v63, %s840_s18 }
 0x2db   :  { %499 = vrot.lane.b32.xlu1 %v1248_v6, %s838_s0 }
 0x2df   :  { %447 = vrot.lane.b32.xlu1 %v1240_v63, %s842_s19 }
 0x2e3   :  { %483 = vrot.lane.b32.xlu1 %v1248_v6, %s839_s17 }
 0x2e7   :  { %467 = vrot.lane.b32.xlu1 %v1248_v6, %s840_s18 }
 0x2eb   :  { %451 = vrot.lane.b32.xlu1 %v1248_v6, %s842_s19 }
 0x315   :  { %v528_v22 = vpop.permute.xlu0 %527  ;;  %v560_v36 = vpop.permute.xlu1 %559 }
 0x319   :  { %v564_v41 = vpop.permute.xlu0 %563  ;;  %v562_v19 = vpop.permute.xlu1 %561 }
 0x31a   :  { %v572_v21 = vsel %vm201_vm0, %v564_v41, 0.0  ;;  %v566_v25 = vsel %vm201_vm0, %v560_v36, %v562_v19  ;;  %v567_v32 = vsel %vm201_vm0, %v562_v19, %v564_v41 }
 0x31b   :  { %v608_v35 = vmul.f32 %v572_v21, %v1018_v29  ;;  %v606_v18 = vmul.f32 %v566_v25, %v978_v7  ;;  %v607_v38 = vmul.f32 %v567_v32, %v1023_v30 }
 0x31d   :  { %697 = vmatprep.subr.mxu1 %v608_v35  ;;  %v512_v40 = vpop.permute.xlu0 %511  ;;  %626 = vmatprep.subr.mxu0 %v606_v18  ;;  %v558_v37 = vpop.permute.xlu1 %557 }
 0x31e   :  { %v565_v52 = vsel %vm201_vm0, %v558_v37, %v560_v36  ;;  %698 = vmatpush1.msra.mxu1 %v607_v38 }
 0x31f   :  { %v605_v53 = vmul.f32 %v565_v52, %v984_v11 }
 0x321   :  { %v548_v54 = vpop.permute.xlu0 %547  ;;  %627 = vmatpush1.msra.mxu0 %v605_v53  ;;  %v544_v55 = vpop.permute.xlu1 %543 }
 0x322   :  { %v556_v4 = vsel %vm184_vm1, %v548_v54, 0.0 }
 0x323   :  { %v604_v29 = vmul.f32 %v556_v4, %v1051_v46  ;;  %v590_v4 = vmul.f32 %v1240_v63, %v1046_v45 }
 0x325   :  { %v532_v58 = vpop.permute.xlu0 %531  ;;  %699 = vmatprep.subr.mxu1 %v604_v29  ;;  %v546_v7 = vpop.permute.xlu1 %545 }
 0x326   :  { %v540_v30 = vsel %vm167_vm2, %v532_v58, 0.0  ;;  %v550_v51 = vsel %vm184_vm1, %v544_v55, %v546_v7  ;;  %v551_v31 = vsel %vm184_vm1, %v546_v7, %v548_v54 }
 0x327   :  { %v600_v36 = vmul.f32 %v540_v30, %v1081_v60  ;;  %v602_v11 = vmul.f32 %v550_v51, %v991_v14  ;;  %v603_v41 = vmul.f32 %v551_v31, %v1041_v44 }
 0x329   :  { %628 = vmatprep.subr.mxu0 %v602_v11  ;;  %700 = vmatpush1.msra.mxu1 %v603_v41  ;;  %v542_v19 = vpop.permute.xlu1 %541  ;;  %v496_v18 = vpop.permute.xlu0 %495 }
 0x32a   :  { %v549_v46 = vsel %vm184_vm1, %v542_v19, %v544_v55  ;;  %701 = vmatprep.subr.mxu1 %v600_v36  ;;  %v591_v36 = vmul.f32 %v1246_v5, %v1116_v20 }
 0x32b   :  { %v601_v21 = vmul.f32 %v549_v46, %v996_v15 }
 0x32d   :  { %629 = vmatpush1.msra.mxu0 %v601_v21  ;;  %v530_v25 = vpop.permute.xlu1 %529  ;;  %v478_v54 = vpop.permute.xlu0 %477 }
 0x32e   :  { %v534_v32 = vsel %vm167_vm2, %v528_v22, %v530_v25  ;;  %v535_v35 = vsel %vm167_vm2, %v530_v25, %v532_v58  ;;  %v492_v51 = vsel %vm116_vm5, 0.0, %v478_v54 }
 0x32f   :  { %v598_v60 = vmul.f32 %v534_v32, %v1006_v23  ;;  %v599_v14 = vmul.f32 %v535_v35, %v1076_v59 }
 0x331   :  { %630 = vmatprep.subr.mxu0 %v598_v60  ;;  %702 = vmatpush1.msra.mxu1 %v599_v14  ;;  %v526_v44 = vpop.permute.xlu1 %525  ;;  %v462_v29 = vpop.permute.xlu0 %461  ;;  %v440_v14 = vld [vmem:[%s1416_s2] sm:$0xff] }
 0x332   :  { %v533_v38 = vsel %vm167_vm2, %v526_v44, %v528_v22 }
 0x333   :  { %v597_v37 = vmul.f32 %v533_v38, %v1013_v28  ;;  %v589_v28 = vmul.f32 %v1254_v24, %v1061_v48 }
 0x335   :  { %631 = vmatpush1.msra.mxu0 %v597_v37  ;;  %v514_v15 = vpop.permute.xlu1 %513  ;;  %v498_v30 = vpop.permute.xlu0 %497 }
 0x336   :  { %v518_v52 = vsel %vm150_vm3, %v512_v40, %v514_v15  ;;  %v502_v20 = vsel %vm133_vm4, %v496_v18, %v498_v30 }
 0x337   :  { %v594_v53 = vmul.f32 %v518_v52, %v1034_v39  ;;  %v587_v21 = vmul.f32 %v502_v20, %v1160_v56 }
 0x339   :  { %632 = vmatprep.subr.mxu0 %v594_v53  ;;  %v510_v55 = vpop.permute.xlu1 %509  ;;  %v446_v19 = vpop.permute.xlu0 %445 }
 0x33a   :  { %v517_v23 = vsel %vm150_vm3, %v510_v55, %v512_v40  ;;  %v460_v32 = vsel %vm82_vm7, 0.0, %v446_v19 }
 0x33b   :  { %v593_v59 = vmul.f32 %v517_v23, %v1056_v47  ;;  %v573_v60 = vmul.f32 %v460_v32, %v1174_v8 }
 0x33d   :  { %633 = vmatpush1.msra.mxu0 %v593_v59  ;;  %v494_v22 = vpop.permute.xlu1 %493  ;;  %v482_v25 = vpop.permute.xlu0 %481 }
 0x33e   :  { %v501_v58 = vsel %vm133_vm4, %v494_v22, %v496_v18  ;;  %v508_v39 = vsel %vm133_vm4, 0.0, %v494_v22  ;;  %634 = vmatprep.subr.mxu0 %v590_v4 }
 0x33f   :  { %v585_v7 = vmul.f32 %v508_v39, %v1110_v16  ;;  %v586_v40 = vmul.f32 %v501_v58, %v1090_v9  ;;  %635 = vmatpush1.msra.mxu0 %v589_v28  ;;  %v592_v9 = vmul.f32 %v1248_v6, %v1105_v13 }
 0x341   :  { %v516_v47 = vpop.permute.xlu1 %515  ;;  %636 = vmatprep.subr.mxu0 %v586_v40  ;;  %v466_v56 = vpop.permute.xlu0 %465 }
 0x342   :  { %v519_v45 = vsel %vm150_vm3, %v514_v15, %v516_v47  ;;  %v524_v63 = vsel %vm150_vm3, %v516_v47, 0.0  ;;  %637 = vmatpush1.msra.mxu0 %v585_v7 }
 0x343   :  { %v595_v48 = vmul.f32 %v519_v45, %v1095_v10  ;;  %v596_v24 = vmul.f32 %v524_v63, %v1100_v12  ;;  %v581_v10 = vmul.f32 %v492_v51, %v1130_v33  ;;  %v476_v12 = vsel %vm99_vm6, 0.0, %v462_v29 }
 0x344   :  { %v577_v6 = vmul.f32 %v476_v12, %v1146_v43  ;;  %v777_v12 = vld [vmem:[%s1418_s7] sm:$0xff] }
 0x345   :  { %703 = vmatprep.subr.mxu1 %v596_v24  ;;  %v480_v31 = vpop.permute.xlu1 %479  ;;  %v450_v53 = vpop.permute.xlu0 %449 }
 0x346   :  { %v485_v16 = vsel %vm116_vm5, %v478_v54, %v480_v31  ;;  %704 = vmatpush1.msra.mxu1 %v595_v48 }
 0x347   :  { %v582_v11 = vmul.f32 %v485_v16, %v1135_v34  ;;  %705 = vmatprep.subr.mxu1 %v592_v9 }
 0x348   :  { %706 = vmatpush1.msra.mxu1 %v591_v36  ;;  %v773_v36 = vld [vmem:[%s1417_s6] sm:$0xff] }
 0x349   :  { %v464_v41 = vpop.permute.xlu1 %463  ;;  %638 = vmatprep.subr.mxu0 %v582_v11 }
 0x34a   :  { %v469_v46 = vsel %vm99_vm6, %v462_v29, %v464_v41  ;;  %639 = vmatpush1.msra.mxu0 %v581_v10  ;;  %v470_v8 = vsel %vm99_vm6, %v464_v41, %v466_v56 }
 0x34b   :  { %v578_v13 = vmul.f32 %v469_v46, %v1151_v49  ;;  %v579_v54 = vmul.f32 %v470_v8, %v1206_v42 }
 0x34d   :  { %v500_v5 = vpop.permute.xlu1 %499  ;;  %640 = vmatprep.subr.mxu0 %v578_v13 }
 0x34e   :  { %v503_v34 = vsel %vm133_vm4, %v498_v30, %v500_v5  ;;  %641 = vmatpush1.msra.mxu0 %v577_v6 }
 0x34f   :  { %v588_v33 = vmul.f32 %v503_v34, %v1165_v57  ;;  %v486_v57 = vsel %vm116_vm5, %v480_v31, %v482_v25 }
 0x351   :  { %707 = vmatprep.subr.mxu1 %v588_v33  ;;  %v448_v35 = vpop.permute.xlu1 %447 }
 0x352   :  { %v453_v49 = vsel %vm82_vm7, %v446_v19, %v448_v35  ;;  %708 = vmatpush1.msra.mxu1 %v587_v21  ;;  %v454_v55 = vsel %vm82_vm7, %v448_v35, %v450_v53 }
 0x353   :  { %v574_v43 = vmul.f32 %v453_v49, %v1179_v17  ;;  %v583_v17 = vmul.f32 %v486_v57, %v1188_v26  ;;  %v575_v59 = vmul.f32 %v454_v55, %v1221_v61 }
 0x355   :  { %v484_v44 = vpop.permute.xlu1 %483  ;;  %642 = vmatprep.subr.mxu0 %v574_v43 }
 0x356   :  { %v487_v18 = vsel %vm116_vm5, %v482_v25, %v484_v44  ;;  %643 = vmatpush1.msra.mxu0 %v573_v60 }
 0x357   :  { %v584_v38 = vmul.f32 %v487_v18, %v1193_v27  ;;  %816 = vmatmul.mubr.msk.f32.vlgmr.msra.gmra.mxu0 %vm246_vm8, %v440_v14 }
 0x359   :  { %709 = vmatprep.subr.mxu1 %v584_v38  ;;  %v468_v37 = vpop.permute.xlu1 %467 }
 0x35a   :  { %v471_v15 = vsel %vm99_vm6, %v466_v56, %v468_v37  ;;  %710 = vmatpush1.msra.mxu1 %v583_v17 }
 0x35b   :  { %v580_v52 = vmul.f32 %v471_v15, %v1211_v50 }
 0x35d   :  { %711 = vmatprep.subr.mxu1 %v580_v52  ;;  %v452_v27 = vpop.permute.xlu1 %451 }
 0x35e   :  { %v455_v23 = vsel %vm82_vm7, %v450_v53, %v452_v27  ;;  %712 = vmatpush1.msra.mxu1 %v579_v54 }
 0x35f   :  { %v576_v26 = vmul.f32 %v455_v23, %v1226_v62 }
 0x361   :  { %713 = vmatprep.subr.mxu1 %v576_v26 }
 0x362   :  { %714 = vmatpush1.msra.mxu1 %v575_v59 }
 0x363   :  { %817 = vmatmul.mubr.msk.f32.vlgmr.msra.gmra.mxu1 %vm246_vm8, %v440_v14 }
 0x417   :  { %v678_v4 = vpop.f32.mrf.mxu0 }
 0x418   :  { %v760_v22 = vmul.f32 %v678_v4, %v678_v4 }
 0x419   :  { %v680_v50 = vpop.f32.mrf.mxu0 }
 0x41a   :  { %v761_v28 = vmul.f32 %v680_v50, %v680_v50  ;;  %v754_v42 = vadd.f32 %v680_v50, %v678_v4 }
 0x41c   :  { %v764_v58 = vadd.f32 %v761_v28, %v760_v22 }
 0x423   :  { %v749_v29 = vpop.f32.mrf.mxu1 }
 0x424   :  { %v762_v39 = vmul.f32 %v749_v29, %v749_v29  ;;  %v755_v7 = vadd.f32 %v754_v42, %v749_v29 }
 0x425   :  { %v751_v40 = vpop.f32.mrf.mxu1 }
 0x426   :  { %v763_v47 = vmul.f32 %v751_v40, %v751_v40  ;;  %v756_v45 = vadd.f32 %v755_v7, %v751_v40  ;;  %v765_v63 = vadd.f32 %v764_v58, %v762_v39 }
 0x428   :  { %757 = vadd.xlane.f32.xlu0 %v756_v45  ;;  %v766_v62 = vadd.f32 %v765_v63, %v763_v47 }
 0x42a   :  { %767 = vadd.xlane.f32.xlu1 %v766_v62 }
 0x4b1   :  { %v758_v61 = vpop.xlane.xlu0 %757 }
 0x4b2   :  { %v759_v48 = vmul.f32 0.001953125, %v758_v61 }
 0x4b3   :  { %v768_v24 = vpop.xlane.xlu1 %767 }
 0x4b4   :  { %v770_v30 = vmul.f32 %v759_v48, %v759_v48  ;;  %v769_v51 = vmul.f32 0.001953125, %v768_v24 }
 0x4b6   :  { %v771_v31 = vsub.f32 %v769_v51, %v770_v30 }
 0x4b8   :  { %v772_v9 = vmax.f32 %v771_v31, 0.0 }
 0x4ba   :  { %v774_v16 = vadd.f32 1e-05, %v772_v9 }
 0x4bc   :  { %832 = vrsqrt.f32 %v774_v16 }
 0x4c9   :  { %v833_v11 = vpop.eup %832 }
 0x4ca   :  { %v776_v10 = vmul.f32 %v833_v11, %v773_v36 }
 0x4cc   :  { %782 = vperm.xlu0 %828, %v776_v10   ;;  %v778_v41 = vmul.f32 %v776_v10, %v759_v48 }
 0x4ce   :  { %v779_v19 = vsub.f32 %v777_v12, %v778_v41 }
 0x4d0   :  { %791 = vperm.xlu1 %829, %v779_v19  }
 0x547   :  { %v783_v46 = vpop.permute.xlu0 %782 }
 0x548   :  { %v785_v13 = vmul.f32 %v783_v46, %v678_v4  ;;  %v786_v6 = vmul.f32 %v783_v46, %v680_v50  ;;  %v787_v20 = vmul.f32 %v783_v46, %v749_v29  ;;  %v788_v5 = vmul.f32 %v783_v46, %v751_v40 }
 0x54b   :  { %v792_v34 = vpop.permute.xlu1 %791 }
 0x54c   :  { %v794_v33 = vadd.f32 %v792_v34, %v785_v13  ;;  %v795_v21 = vadd.f32 %v792_v34, %v786_v6  ;;  %v796_v25 = vadd.f32 %v792_v34, %v787_v20  ;;  %v797_v32 = vadd.f32 %v792_v34, %v788_v5 }
 0x54e   :  { %v798_v35 = vadd.f32 %v794_v33, %v897_v1  ;;  %v799_v49 = vadd.f32 %v795_v21, %v892_v0  ;;  %v800_v43 = vadd.f32 %v796_v25, %v906_v2  ;;  %v801_v60 = vadd.f32 %v797_v32, %v923_v3 }
 0x550   :  { %v802_v14 = vmax.f32 %v798_v35, 0.0  ;;  %v803_v57 = vmax.f32 %v799_v49, 0.0  ;;  %v804_v44 = vmax.f32 %v800_v43, 0.0  ;;  %v805_v56 = vmax.f32 %v801_v60, 0.0 }
 0x552   :  { %806 = vst [vmem:[%s1419_s8] sm:$0xff] %v802_v14  ;;  %807 = vst [vmem:[%s1419_s8 + $0x8] sm:$0xff] %v803_v57 }
 0x553   :  { %808 = vst [vmem:[%s1419_s8 + $0x10] sm:$0xff] %v804_v44  ;;  %809 = vst [vmem:[%s1419_s8 + $0x18] sm:$0xff] %v805_v56 }

</bundles_post_ra>
